<compile_context>
chip_gen: v7x
topology: tpu7x:2x2x1
jax: 0.10.0
libtpu: 0.0.40
codegen_flags: <defaults>
</compile_context>

<pallas_src>
import functools

import jax
import jax.numpy as jnp
from jax.experimental import pallas as pl
from jax.experimental.pallas import tpu as pltpu

_HIDDEN = 512
_LANE = 128
_SUBLANE = 8


def _round_up(n, m):
    return ((n + m - 1) // m) * m


def _batch_tiling(batch):
    """Padded batch and row-tile size (feedback: 128-256 rows once batches grow)."""
    bp = _round_up(max(int(batch), 1), _SUBLANE)
    if bp <= 256:
        return bp, bp
    tb = 128
    return _round_up(bp, tb), tb


def _is_multi_tensorcore():
    """True on chips with 2 TensorCores (v7x); False on v5e/v6e/unknown."""
    try:
        kind = jax.devices()[0].device_kind.lower()
    except Exception:
        return False
    return "v7" in kind


# ----------------------------------------------------------------------------- kernels
def _head_kernel(x_ref, w1_ref, b1_ref, w2_ref, b2_ref, o_ref):
    """One head (head axis squeezed).  bf16 MXU matmuls, f32 bias/ReLU/accumulate."""
    x = x_ref[...].astype(jnp.bfloat16)                       # (TB, Dk)
    h = jnp.dot(x, w1_ref[...], preferred_element_type=jnp.float32)
    h = jnp.maximum(h + b1_ref[...], 0.0)                     # f32 VPU (v5e-safe)
    y = jnp.dot(h.astype(jnp.bfloat16), w2_ref[...],
                preferred_element_type=jnp.float32)
    o_ref[...] = y + b2_ref[...]                              # lane-dense f32 store


def _head_kernel_prefetch(head_ref, x_ref, w1_ref, b1_ref, w2_ref, b2_ref, o_ref):
    """Single-head path; head index already consumed by the index_maps (SMEM)."""
    del head_ref
    _head_kernel(x_ref, w1_ref, b1_ref, w2_ref, b2_ref, o_ref)


def _fused_heads_kernel(x_ref, w1_ref, b1_ref, w2_ref, b2_ref, o_ref):
    """Both heads in ONE grid step (single-TensorCore chips): unrolled over H=2 so
    the two independent MXU chains interleave and no extra grid-step cost is paid."""
    for hd in range(x_ref.shape[0]):
        x = x_ref[hd].astype(jnp.bfloat16)                    # (TB, Dk)
        h = jnp.dot(x, w1_ref[hd], preferred_element_type=jnp.float32)
        h = jnp.maximum(h + b1_ref[hd], 0.0)
        y = jnp.dot(h.astype(jnp.bfloat16), w2_ref[hd],
                    preferred_element_type=jnp.float32)
        o_ref[hd] = y + b2_ref[hd]


# ----------------------------------------------------------------------------- wrappers
@functools.partial(jax.jit, static_argnames=("d_out",))
def _forward_single(head_idx, x, w1s, b1s, w2s, b2s, *, d_out):
    """One head selected at runtime via scalar prefetch; one compiled program for both."""
    B, d_in = x.shape
    _, dk, hid = w1s.shape
    dp = w2s.shape[-1]
    bp, tb = _batch_tiling(B)
    x = jnp.pad(x, ((0, bp - B), (0, dk - d_in)))             # lane-pad K, sublane-pad B
    nb = bp // tb

    out = pl.pallas_call(
        _head_kernel_prefetch,
        out_shape=jax.ShapeDtypeStruct((bp, dp), jnp.float32),
        grid_spec=pltpu.PrefetchScalarGridSpec(
            num_scalar_prefetch=1,
            grid=(nb,),                                        # batch tiles
            in_specs=[
                pl.BlockSpec((tb, dk), lambda b, head: (b, 0)),           # x streams
                pl.BlockSpec((None, dk, hid), lambda b, head: (head[0], 0, 0)),
                pl.BlockSpec((None, 1, hid), lambda b, head: (head[0], 0, 0)),
                pl.BlockSpec((None, hid, dp), lambda b, head: (head[0], 0, 0)),
                pl.BlockSpec((None, 1, dp), lambda b, head: (head[0], 0, 0)),
            ],
            out_specs=pl.BlockSpec((tb, dp), lambda b, head: (b, 0)),
        ),
        compiler_params=pltpu.CompilerParams(
            dimension_semantics=("parallel",),                 # batch tiles -> both TCs
            vmem_limit_bytes=32 * 1024 * 1024,
        ),
    )(head_idx, x, w1s, b1s, w2s, b2s)
    return out[:B, :d_out]


@functools.partial(jax.jit, static_argnames=("d_out", "multi_tc"))
def _forward_both(x_stack, w1s, b1s, w2s, b2s, *, d_out, multi_tc):
    """Online + target in a single pallas_call (the preferred training-step path)."""
    H, B, d_in = x_stack.shape
    _, dk, hid = w1s.shape
    dp = w2s.shape[-1]
    bp, tb = _batch_tiling(B)
    x_stack = jnp.pad(x_stack, ((0, 0), (0, bp - B), (0, dk - d_in)))
    nb = bp // tb

    if multi_tc:
        # v7x: one head per TensorCore via a "parallel" head grid axis.
        out = pl.pallas_call(
            _head_kernel,
            out_shape=jax.ShapeDtypeStruct((H, bp, dp), jnp.float32),
            grid=(H, nb),
            in_specs=[
                pl.BlockSpec((None, tb, dk), lambda h, b: (h, b, 0)),
                pl.BlockSpec((None, dk, hid), lambda h, b: (h, 0, 0)),
                pl.BlockSpec((None, 1, hid), lambda h, b: (h, 0, 0)),
                pl.BlockSpec((None, hid, dp), lambda h, b: (h, 0, 0)),
                pl.BlockSpec((None, 1, dp), lambda h, b: (h, 0, 0)),
            ],
            out_specs=pl.BlockSpec((None, tb, dp), lambda h, b: (h, b, 0)),
            compiler_params=pltpu.CompilerParams(
                dimension_semantics=("parallel", "parallel"),
                vmem_limit_bytes=32 * 1024 * 1024,
            ),
        )(x_stack, w1s, b1s, w2s, b2s)
    else:
        # v5e / v6e (single TensorCore): no head grid axis -> one grid step per batch
        # tile computes BOTH heads (no 2x grid-step / pipeline-prologue overhead).
        out = pl.pallas_call(
            _fused_heads_kernel,
            out_shape=jax.ShapeDtypeStruct((H, bp, dp), jnp.float32),
            grid=(nb,),
            in_specs=[
                pl.BlockSpec((H, tb, dk), lambda b: (0, b, 0)),
                pl.BlockSpec((H, dk, hid), lambda b: (0, 0, 0)),   # weights resident
                pl.BlockSpec((H, 1, hid), lambda b: (0, 0, 0)),
                pl.BlockSpec((H, hid, dp), lambda b: (0, 0, 0)),
                pl.BlockSpec((H, 1, dp), lambda b: (0, 0, 0)),
            ],
            out_specs=pl.BlockSpec((H, tb, dp), lambda b: (0, b, 0)),
            compiler_params=pltpu.CompilerParams(
                dimension_semantics=("parallel",),
                vmem_limit_bytes=32 * 1024 * 1024,
            ),
        )(x_stack, w1s, b1s, w2s, b2s)
    return out[:, :B, :d_out]


# ----------------------------------------------------------------------------- module
def _init_linear_params(key, in_dim, out_dim):
    """Deterministic init mimicking torch.nn.Linear default U(-1/sqrt(in), 1/sqrt(in))."""
    kw, kb = jax.random.split(key)
    bound = 1.0 / float(in_dim) ** 0.5
    # Stored as (in_dim, out_dim): transpose of PyTorch's (out, in) layout.
    w = jax.random.uniform(kw, (in_dim, out_dim), jnp.float32, -bound, bound)
    b = jax.random.uniform(kb, (1, out_dim), jnp.float32, -bound, bound)
    return w, b


class AssaultNetPallas:
    """Pallas port of AssaultNet: online and target MLP heads sharing architecture.

    Forward-only port; the target head is a frozen copy (requires_grad=False in torch
    just means no gradients flow — irrelevant for inference)."""

    _HEAD = {"online": 0, "target": 1}

    def __init__(self, input_dim, output_dim, key):
        self.input_dim = int(input_dim)
        self.output_dim = int(output_dim)
        self.d_in_pad = _round_up(max(self.input_dim, 1), _LANE)
        self.d_out_pad = _round_up(max(self.output_dim, 1), _LANE)
        self._multi_tc = _is_multi_tensorcore()

        k1, k2 = jax.random.split(key)
        w1, b1 = _init_linear_params(k1, self.input_dim, _HIDDEN)
        w2, b2 = _init_linear_params(k2, _HIDDEN, self.output_dim)

        # Lane-pad once at init: zero K-rows on W1 (matches zero-padded x columns),
        # zero N-cols on W2/b2 (sliced off after the kernel).
        w1 = jnp.pad(w1, ((0, self.d_in_pad - self.input_dim), (0, 0)))
        w2 = jnp.pad(w2, ((0, 0), (0, self.d_out_pad - self.output_dim)))
        b2 = jnp.pad(b2, ((0, 0), (0, self.d_out_pad - self.output_dim)))

        online = (w1.astype(jnp.bfloat16), b1, w2.astype(jnp.bfloat16), b2)
        target = tuple(jnp.array(p) for p in online)   # deepcopy; forward-only copy
        # Heads stacked on a leading axis: index 0 = online, 1 = target.
        self.stacked = tuple(jnp.stack([o, t]) for o, t in zip(online, target))

    def head_params(self, model):
        idx = self._HEAD[model]
        return tuple(p[idx] for p in self.stacked)

    def forward(self, x, model):
        if model not in self._HEAD:
            raise ValueError(f"unknown model {model!r}")
        x = jnp.asarray(x, jnp.float32)                 # mirrors `input.float()`
        head = jnp.asarray([self._HEAD[model]], jnp.int32)   # runtime head select
        return _forward_single(head, x, *self.stacked, d_out=self.output_dim)

    def forward_both(self, x_online, x_target):
        """Preferred training-step path: both heads in one pallas_call."""
        xs = jnp.stack([jnp.asarray(x_online, jnp.float32),
                        jnp.asarray(x_target, jnp.float32)])
        return _forward_both(xs, *self.stacked, d_out=self.output_dim,
                             multi_tc=self._multi_tc)


if __name__ == "__main__":
    key = jax.random.PRNGKey(0)
    k_params, k_x = jax.random.split(key)

    batch, input_dim, output_dim = 8, 32, 8
    net = AssaultNetPallas(input_dim, output_dim, k_params)
    x = jax.random.normal(k_x, (batch, input_dim), jnp.float32)

    y_online = jax.block_until_ready(net.forward(x, "online"))
    y_target = jax.block_until_ready(net.forward(x, "target"))
    y_both = jax.block_until_ready(net.forward_both(x, x))     # fused single launch

    # Reference 1: same mixed-precision math as the kernel (bf16 weights, f32 acc).
    def ref_bf16(x, params, d_out):
        w1, b1, w2, b2 = params
        xp = jnp.pad(x, ((0, 0), (0, w1.shape[0] - x.shape[1])))
        h = jnp.dot(xp.astype(jnp.bfloat16), w1,
                    preferred_element_type=jnp.float32) + b1
        h = jnp.maximum(h, 0.0)
        y = jnp.dot(h.astype(jnp.bfloat16), w2,
                    preferred_element_type=jnp.float32) + b2
        return y[:, :d_out]

    # Reference 2: full-fp32 math (bounds the bf16 quantization error vs. torch fp32).
    def ref_f32(x, params, d_out):
        w1, b1, w2, b2 = params
        xp = jnp.pad(x, ((0, 0), (0, w1.shape[0] - x.shape[1])))
        h = jnp.maximum(jnp.dot(xp, w1.astype(jnp.float32)) + b1, 0.0)
        return (jnp.dot(h, w2.astype(jnp.float32)) + b2)[:, :d_out]

    r_online = ref_bf16(x, net.head_params("online"), output_dim)
    r_target = ref_bf16(x, net.head_params("target"), output_dim)
    r_online_f32 = ref_f32(x, net.head_params("online"), output_dim)

    assert y_online.shape == (batch, output_dim)
    assert y_target.shape == (batch, output_dim)
    assert y_both.shape == (2, batch, output_dim)
    assert jnp.allclose(y_online, r_online, atol=1e-2, rtol=1e-2)
    assert jnp.allclose(y_target, r_target, atol=1e-2, rtol=1e-2)
    assert jnp.allclose(y_online, r_online_f32, atol=5e-2, rtol=5e-2)  # bf16 quant bound
    assert jnp.allclose(y_both[0], y_online, atol=1e-5)
    assert jnp.allclose(y_both[1], y_target, atol=1e-5)
    assert jnp.allclose(y_online, y_target, atol=1e-6)  # target is a copy of online

    print("KERNEL_OK")
</pallas_src>

<mosaic_0001>
module attributes {stable_mosaic.version = 11 : i64} {
  func.func @_head_kernel_prefetch(%arg0: i32, %arg1: memref<1xi32, #tpu.memory_space<smem>>, %arg2: memref<8x128xf32, #tpu.memory_space<vmem>>, %arg3: memref<1x128x512xbf16, #tpu.memory_space<vmem>>, %arg4: memref<1x1x512xf32, #tpu.memory_space<vmem>>, %arg5: memref<1x512x128xbf16, #tpu.memory_space<vmem>>, %arg6: memref<1x1x128xf32, #tpu.memory_space<vmem>>, %arg7: memref<8x128xf32, #tpu.memory_space<vmem>>) attributes {dimension_semantics = [#tpu.dimension_semantics<parallel>], iteration_bounds = array<i64: 1>, scalar_prefetch = 1 : i64, scratch_operands = 0 : i64, tpu.core_type = #tpu.core_type<tc>, window_params = [{transform_indices = @transform_0, window_bounds = array<i64: 8, 128>}, {transform_indices = @transform_1, window_bounds = array<i64: 1, 128, 512>}, {transform_indices = @transform_2, window_bounds = array<i64: 1, 1, 512>}, {transform_indices = @transform_3, window_bounds = array<i64: 1, 512, 128>}, {transform_indices = @transform_4, window_bounds = array<i64: 1, 1, 128>}, {transform_indices = @transform_5, window_bounds = array<i64: 8, 128>}]} {
    %c0 = arith.constant 0 : index
    %c0_0 = arith.constant 0 : index
    %0 = vector.load %arg2[%c0, %c0_0] : memref<8x128xf32, #tpu.memory_space<vmem>>, vector<8x128xf32>
    %1 = arith.truncf %0 : vector<8x128xf32> to vector<8x128xbf16>
    %c0_1 = arith.constant 0 : index
    %c0_2 = arith.constant 0 : index
    %c0_3 = arith.constant 0 : index
    %2 = vector.load %arg3[%c0_1, %c0_2, %c0_3] : memref<1x128x512xbf16, #tpu.memory_space<vmem>>, vector<1x128x512xbf16>
    %3 = vector.shape_cast %2 : vector<1x128x512xbf16> to vector<128x512xbf16>
    %cst = arith.constant dense<0.000000e+00> : vector<8x512xf32>
    %4 = tpu.matmul %1, %3, %cst {dimension_numbers = #tpu.dot_dimension_numbers<[1], [0], [0], [1], [0, 0, 1, 1], [], []>} : vector<8x128xbf16>, vector<128x512xbf16>, vector<8x512xf32> -> vector<8x512xf32>
    %c0_4 = arith.constant 0 : index
    %c0_5 = arith.constant 0 : index
    %c0_6 = arith.constant 0 : index
    %5 = vector.load %arg4[%c0_4, %c0_5, %c0_6] : memref<1x1x512xf32, #tpu.memory_space<vmem>>, vector<1x1x512xf32>
    %6 = vector.shape_cast %5 : vector<1x1x512xf32> to vector<1x512xf32>
    %7 = vector.broadcast %6 : vector<1x512xf32> to vector<8x512xf32>
    %8 = arith.addf %4, %7 : vector<8x512xf32>
    %cst_7 = arith.constant 0.000000e+00 : f32
    %9 = vector.broadcast %cst_7 : f32 to vector<8x512xf32>
    %10 = arith.maximumf %8, %9 : vector<8x512xf32>
    %11 = arith.truncf %10 : vector<8x512xf32> to vector<8x512xbf16>
    %c0_8 = arith.constant 0 : index
    %c0_9 = arith.constant 0 : index
    %c0_10 = arith.constant 0 : index
    %12 = vector.load %arg5[%c0_8, %c0_9, %c0_10] : memref<1x512x128xbf16, #tpu.memory_space<vmem>>, vector<1x512x128xbf16>
    %13 = vector.shape_cast %12 : vector<1x512x128xbf16> to vector<512x128xbf16>
    %cst_11 = arith.constant dense<0.000000e+00> : vector<8x128xf32>
    %14 = tpu.matmul %11, %13, %cst_11 {dimension_numbers = #tpu.dot_dimension_numbers<[1], [0], [0], [1], [0, 0, 1, 1], [], []>} : vector<8x512xbf16>, vector<512x128xbf16>, vector<8x128xf32> -> vector<8x128xf32>
    %c0_12 = arith.constant 0 : index
    %c0_13 = arith.constant 0 : index
    %c0_14 = arith.constant 0 : index
    %15 = vector.load %arg6[%c0_12, %c0_13, %c0_14] : memref<1x1x128xf32, #tpu.memory_space<vmem>>, vector<1x1x128xf32>
    %16 = vector.shape_cast %15 : vector<1x1x128xf32> to vector<1x128xf32>
    %17 = vector.broadcast %16 : vector<1x128xf32> to vector<8x128xf32>
    %18 = arith.addf %14, %17 : vector<8x128xf32>
    %c0_15 = arith.constant 0 : index
    %c0_16 = arith.constant 0 : index
    %19 = vector.load %arg7[%c0_15, %c0_16] : memref<8x128xf32, #tpu.memory_space<vmem>>, vector<8x128xf32>
    tpu.vector_store %arg7[%c0_15, %c0_16], %18 {strides = array<i32>} : memref<8x128xf32, #tpu.memory_space<vmem>>, vector<8x128xf32>,
    return
  }
  func.func @transform_0(%arg0: i32, %arg1: memref<1xi32, #tpu.memory_space<smem>>) -> (i32, i32) {
    %c0_i32 = arith.constant 0 : i32
    %c0_i32_0 = arith.constant 0 : i32
    return %arg0, %c0_i32 : i32, i32
  }
  func.func @transform_1(%arg0: i32, %arg1: memref<1xi32, #tpu.memory_space<smem>>) -> (i32, i32, i32) {
    %c0 = arith.constant 0 : index
    %0 = memref.load %arg1[%c0] : memref<1xi32, #tpu.memory_space<smem>>
    %c0_i32 = arith.constant 0 : i32
    %c0_i32_0 = arith.constant 0 : i32
    %c0_i32_1 = arith.constant 0 : i32
    return %0, %c0_i32, %c0_i32_0 : i32, i32, i32
  }
  func.func @transform_2(%arg0: i32, %arg1: memref<1xi32, #tpu.memory_space<smem>>) -> (i32, i32, i32) {
    %c0 = arith.constant 0 : index
    %0 = memref.load %arg1[%c0] : memref<1xi32, #tpu.memory_space<smem>>
    %c0_i32 = arith.constant 0 : i32
    %c0_i32_0 = arith.constant 0 : i32
    %c0_i32_1 = arith.constant 0 : i32
    return %0, %c0_i32, %c0_i32_0 : i32, i32, i32
  }
  func.func @transform_3(%arg0: i32, %arg1: memref<1xi32, #tpu.memory_space<smem>>) -> (i32, i32, i32) {
    %c0 = arith.constant 0 : index
    %0 = memref.load %arg1[%c0] : memref<1xi32, #tpu.memory_space<smem>>
    %c0_i32 = arith.constant 0 : i32
    %c0_i32_0 = arith.constant 0 : i32
    %c0_i32_1 = arith.constant 0 : i32
    return %0, %c0_i32, %c0_i32_0 : i32, i32, i32
  }
  func.func @transform_4(%arg0: i32, %arg1: memref<1xi32, #tpu.memory_space<smem>>) -> (i32, i32, i32) {
    %c0 = arith.constant 0 : index
    %0 = memref.load %arg1[%c0] : memref<1xi32, #tpu.memory_space<smem>>
    %c0_i32 = arith.constant 0 : i32
    %c0_i32_0 = arith.constant 0 : i32
    %c0_i32_1 = arith.constant 0 : i32
    return %0, %c0_i32, %c0_i32_0 : i32, i32, i32
  }
  func.func @transform_5(%arg0: i32, %arg1: memref<1xi32, #tpu.memory_space<smem>>) -> (i32, i32) {
    %c0_i32 = arith.constant 0 : i32
    %c0_i32_0 = arith.constant 0 : i32
    return %arg0, %c0_i32 : i32, i32
  }
}

</mosaic_0001>

<bundles_post_ra>
// kernel: _forward_single.1
= control target key start
LH: loop header
LB: loop body
LE: loop exit
PB: predicated region body
PF: predicated region fallthrough
CT: control target
= control target key end

     0   :  { %12 = vsyncpa [#allocation5], 0  ;;  %s1154_s0 = inlined_call_operand.<no memory space> [shape: s32[1], index: 0, kind: input, shape index: {}]   ;;  %s1155_s1 = inlined_call_operand.vmem [shape: f32[8,128], index: 1, kind: input, shape index: {}]   ;;  %s1156_s2 = inlined_call_operand.hbm [shape: bf16[2,128,512], index: 2, kind: input, shape index: {}]   ;;  %s1157_s3 = inlined_call_operand.vmem [shape: f32[2,1,512], index: 3, kind: input, shape index: {}]   ;;  %s1158_s4 = inlined_call_operand.hbm [shape: bf16[2,512,128], index: 4, kind: input, shape index: {}]   ;;  %s1159_s5 = inlined_call_operand.vmem [shape: f32[2,1,128], index: 5, kind: input, shape index: {}]   ;;  %s1160_s6 = inlined_call_operand.hbm [shape: f32[8,128], index: 6, kind: output, shape index: {}]  }
   0x1   :  { %13 = vsyncpa [#allocation8], 0 }
   0x2   :  { %14 = vsyncpa [#allocation6], 0  ;;  %s842_s23 = sshll.u32 %s1154_s0, 12  ;;  %s1052_s27 = smov [#allocation4]  }
   0x3   :  { %s25_s26 = scalar_lea.hbm %s1156_s2, %s842_s23  ;;  %s26_s28 = sshll.u32 %s1052_s27, 4  ;;  %s27_s28 = int_to_ptr.vmem [resolvable:$true] %s26_s28 }
   0x4   :  { %s1104_s7 = scalar_lea.hbm %s1158_s4, %s842_s23  ;;  %s976_s8 = scalar_lea.hbm %s25_s26, 4096 }
   0x5   :  { %p977_p0 = scmp.ne.s32.totalorder %s25_s26, %s976_s8  ;;  %s978_s11 = scalar_lea.hbm %s1156_s2, 8192 }
   0x6   :  { %p979_p1 = scmp.lt.u32.totalorder %s25_s26, %s1156_s2  ;;  %p980_p2 = scmp.lt.u32.totalorder %s978_s11, %s976_s8 }
   0x7   :  { %p982_p4 = scmp.lt.u32.totalorder %s976_s8, %s25_s26 }
   0x8   :  { %p981_p3 = por %p980_p2, %p979_p1 }
   0xa   :  { %p983_p5 = por %p982_p4, %p981_p3 }
   0xc   :  { %p984_p6 = pnand %p983_p5, %p977_p0 }
   0xe   :  { %987 = shalt.err (!%p984_p6)
}
   0xf   :  { %s988_s14 = scalar_lea.vmem %s27_s28, 4096  ;;  %p993_p8 = scmp.lt.s32.totalorder %s27_s28, %s27_s28 }
  0x10   :  { %p989_p7 = scmp.ne.s32.totalorder %s27_s28, %s988_s14  ;;  %p994_p9 = scmp.lt.s32.totalorder %s988_s14, %s988_s14 }
  0x12   :  { %p995_p10 = por %p994_p9, %p993_p8 }
  0x14   :  { %p996_p11 = pnand %p995_p10, %p989_p7 }
  0x16   :  { %999 = shalt.err (!%p996_p11)
}
  0x17   :  { %s1053_s15 = smov 256   ;;  %s1054_s16 = smov 16  }
  0x18   :  { %32 = dma.hbm_to_vmem [thread:$0]  %s25_s26, 4096, %s27_s28, [#allocation5], %s1053_s15, %s1053_s15, %s1054_s16  }
  0x19   :  { %s1055_s2 = smov [#allocation7]   ;;  %s1000_s18 = scalar_lea.hbm %s1104_s7, 4096 }
  0x1a   :  { %s50_s17 = sshll.u32 %s1055_s2, 4  ;;  %p1001_p12 = scmp.ne.s32.totalorder %s1104_s7, %s1000_s18  ;;  %s51_s17 = int_to_ptr.vmem [resolvable:$true] %s50_s17 }
  0x1b   :  { %s1002_s21 = scalar_lea.hbm %s1158_s4, 8192  ;;  %p1003_p13 = scmp.lt.u32.totalorder %s1104_s7, %s1158_s4 }
  0x1c   :  { %p1004_p0 = scmp.lt.u32.totalorder %s1002_s21, %s1000_s18  ;;  %p1006_p2 = scmp.lt.u32.totalorder %s1000_s18, %s1104_s7 }
  0x1e   :  { %p1005_p1 = por %p1004_p0, %p1003_p13 }
  0x20   :  { %p1007_p3 = por %p1006_p2, %p1005_p1 }
  0x22   :  { %p1008_p4 = pnand %p1007_p3, %p1001_p12 }
  0x24   :  { %1011 = shalt.err (!%p1008_p4)
}
  0x25   :  { %s1012_s24 = scalar_lea.vmem %s51_s17, 4096  ;;  %p1017_p6 = scmp.lt.s32.totalorder %s51_s17, %s51_s17 }
  0x26   :  { %p1013_p5 = scmp.ne.s32.totalorder %s51_s17, %s1012_s24  ;;  %p1018_p7 = scmp.lt.s32.totalorder %s1012_s24, %s1012_s24 }
  0x28   :  { %p1019_p8 = por %p1018_p7, %p1017_p6 }
  0x2a   :  { %p1020_p9 = pnand %p1019_p8, %p1013_p5 }
  0x2c   :  { %1023 = shalt.err (!%p1020_p9)
}
  0x2d   :  { %s1056_s25 = smov 64   ;;  %s1057_s26 = smov 4  }
  0x2e   :  { %56 = dma.hbm_to_vmem [thread:$0]  %s1104_s7, 4096, %s51_s17, [#allocation8], %s1056_s25, %s1056_s25, %s1057_s26  }
  0x2f   :  { %1046 = dma.done.wait [#allocation5], 4096  }
  0x30   :  { %1047 = vsyncadd [#allocation5], 4294963200 }
  0x31   :  { %1048 = dma.done.wait [#allocation8], 4096  }
  0x32   :  { %1049 = vsyncadd [#allocation8], 4294963200  ;;  %v1058_v0 = vmov 0   ;;  %v896_v1 = vld [vmem:[#allocation4 + $0x4] ss:$16 sps:$4 sm:$0xff]   ;;  %v948_v39 = vld [vmem:[#allocation7 + $0x48] sm:$0xff]  }
  0x33   :  { %341 = vmatprep.mubr.bf16.mxu0 %v1058_v0  ;;  %382 = vmatprep.mubr.bf16.mxu1 %v1058_v0  ;;  %v898_v2 = vld [vmem:[#allocation4 + $0xc] ss:$16 sps:$4 sm:$0xff]   ;;  %v900_v3 = vld [vmem:[#allocation4] ss:$16 sps:$4 sm:$0xff]   ;;  %v901_v4 = vld [vmem:[#allocation4 + $0x8] ss:$16 sps:$4 sm:$0xff]  }
  0x34   :  { %309 = vmatprep.subr.bf16.mxu0 %v896_v1  ;;  %350 = vmatprep.subr.bf16.mxu1 %v898_v2  ;;  %v902_v5 = vld [vmem:[#allocation4 + $0x24] ss:$16 sps:$4 sm:$0xff]   ;;  %v904_v6 = vld [vmem:[#allocation4 + $0x2c] ss:$16 sps:$4 sm:$0xff]   ;;  %v906_v7 = vld [vmem:[#allocation4 + $0x20] ss:$16 sps:$4 sm:$0xff]  }
  0x35   :  { %310 = vmatpush1.bf16.msra.mxu0 %v900_v3  ;;  %351 = vmatpush1.bf16.msra.mxu1 %v901_v4  ;;  %v907_v8 = vld [vmem:[#allocation4 + $0x28] ss:$16 sps:$4 sm:$0xff]   ;;  %v908_v9 = vld [vmem:[#allocation4 + $0x44] ss:$16 sps:$4 sm:$0xff]   ;;  %v910_v10 = vld [vmem:[#allocation4 + $0x4c] ss:$16 sps:$4 sm:$0xff]   ;;  %v129_v3 = vlaneseq }
  0x36   :  { %311 = vmatprep.subr.bf16.mxu0 %v902_v5  ;;  %352 = vmatprep.subr.bf16.mxu1 %v904_v6  ;;  %v912_v11 = vld [vmem:[#allocation4 + $0x40] ss:$16 sps:$4 sm:$0xff]   ;;  %v913_v12 = vld [vmem:[#allocation4 + $0x48] ss:$16 sps:$4 sm:$0xff]   ;;  %v914_v13 = vld [vmem:[#allocation4 + $0x64] ss:$16 sps:$4 sm:$0xff]  }
  0x37   :  { %v916_v14 = vld [vmem:[#allocation4 + $0x6c] ss:$16 sps:$4 sm:$0xff]   ;;  %v918_v15 = vld [vmem:[#allocation4 + $0x60] ss:$16 sps:$4 sm:$0xff]   ;;  %v919_v16 = vld [vmem:[#allocation4 + $0x68] ss:$16 sps:$4 sm:$0xff]  }
  0x38   :  { %v920_v17 = vld [vmem:[#allocation4 + $0x84] ss:$16 sps:$4 sm:$0xff]   ;;  %v922_v18 = vld [vmem:[#allocation4 + $0x8c] ss:$16 sps:$4 sm:$0xff]   ;;  %v924_v19 = vld [vmem:[#allocation4 + $0x80] ss:$16 sps:$4 sm:$0xff]  }
  0x39   :  { %312 = vmatpush1.bf16.msra.mxu0 %v906_v7  ;;  %353 = vmatpush1.bf16.msra.mxu1 %v907_v8  ;;  %v925_v20 = vld [vmem:[#allocation4 + $0x88] ss:$16 sps:$4 sm:$0xff]   ;;  %v926_v21 = vld [vmem:[#allocation4 + $0xa4] ss:$16 sps:$4 sm:$0xff]   ;;  %v928_v22 = vld [vmem:[#allocation4 + $0xac] ss:$16 sps:$4 sm:$0xff]  }
  0x3a   :  { %313 = vmatprep.subr.bf16.mxu0 %v908_v9  ;;  %354 = vmatprep.subr.bf16.mxu1 %v910_v10  ;;  %v930_v23 = vld [vmem:[#allocation4 + $0xa0] ss:$16 sps:$4 sm:$0xff]   ;;  %v931_v24 = vld [vmem:[#allocation4 + $0xa8] ss:$16 sps:$4 sm:$0xff]   ;;  %v932_v25 = vld [vmem:[#allocation4 + $0xc4] ss:$16 sps:$4 sm:$0xff]  }
  0x3b   :  { %v934_v26 = vld [vmem:[#allocation4 + $0xcc] ss:$16 sps:$4 sm:$0xff]   ;;  %v936_v27 = vld [vmem:[#allocation4 + $0xc0] ss:$16 sps:$4 sm:$0xff]   ;;  %v937_v28 = vld [vmem:[#allocation4 + $0xc8] ss:$16 sps:$4 sm:$0xff]  }
  0x3c   :  { %v938_v29 = vld [vmem:[#allocation4 + $0xe4] ss:$16 sps:$4 sm:$0xff]   ;;  %v940_v30 = vld [vmem:[#allocation4 + $0xec] ss:$16 sps:$4 sm:$0xff]   ;;  %v942_v31 = vld [vmem:[#allocation4 + $0xe0] ss:$16 sps:$4 sm:$0xff]  }
  0x3d   :  { %314 = vmatpush1.bf16.msra.mxu0 %v912_v11  ;;  %355 = vmatpush1.bf16.msra.mxu1 %v913_v12  ;;  %v943_v32 = vld [vmem:[#allocation4 + $0xe8] ss:$16 sps:$4 sm:$0xff]   ;;  %v93_v33 = vld [vmem:[%s1155_s1] sm:$0xff]  ;;  %v952_v43 = vld [vmem:[#allocation7 + $0x50] sm:$0xff]   ;;  %p81_p10 = scmp.lt.s32.totalorder %s1154_s0, 1  ;;  %v130_v4 = vshrl.u32 %v129_v3, 7 }
  0x3e   :  { %315 = vmatprep.subr.bf16.mxu0 %v914_v13  ;;  %356 = vmatprep.subr.bf16.mxu1 %v916_v14  ;;  %v944_v34 = vld [vmem:[#allocation7 + $0x40] sm:$0xff]   ;;  %v94_v37 = vpack.c.bf16 %v93_v33, %v93_v33  ;;  %v949_v40 = vld [vmem:[#allocation7 + $0xc8] sm:$0xff]   ;;  %v953_v44 = vld [vmem:[#allocation7 + $0xd0] sm:$0xff]   ;;  %s1059_s13 = smov [#allocation9]  }
  0x3f   :  { %v945_v35 = vld [vmem:[#allocation7 + $0xc0] sm:$0xff]   ;;  %v950_v41 = vld [vmem:[#allocation7 + $0x8] sm:$0xff]   ;;  %v954_v45 = vld [vmem:[#allocation7 + $0x10] sm:$0xff]   ;;  %s1162_s0 = smov (!%p81_p10, %s1154_s0), 1  ;;  %v131_v5 = vsub.s32 0, %v130_v4  ;;  %v139_v6 = vsub.s32 2, %v130_v4 }
  0x40   :  { %v946_v36 = vld [vmem:[#allocation7] sm:$0xff]   ;;  %v951_v42 = vld [vmem:[#allocation7 + $0x88] sm:$0xff]   ;;  %v955_v46 = vld [vmem:[#allocation7 + $0x90] sm:$0xff]   ;;  %s776_s7 = sshll.u32 %s1162_s0, 2  ;;  %v135_v8 = vsub.s32 1, %v130_v4  ;;  %v143_v9 = vsub.s32 3, %v130_v4  ;;  %s90_s12 = scalar_lea.vmem %s1159_s5, %s1162_s0 }
  0x41   :  { %316 = vmatpush1.bf16.msra.mxu0 %v918_v15  ;;  %357 = vmatpush1.bf16.msra.mxu1 %v919_v16  ;;  %v947_v38 = vld [vmem:[#allocation7 + $0x80] sm:$0xff]   ;;  %v956_v47 = vld [vmem:[#allocation7 + $0x58] sm:$0xff]   ;;  %v964_v55 = vld [vmem:[#allocation7 + $0x68] sm:$0xff]   ;;  %s84_s10 = scalar_lea.vmem %s1157_s3, %s776_s7  ;;  %s749_s14 = sshll.u32 %s1059_s13, 4  ;;  %s750_s14 = int_to_ptr.vmem [resolvable:$true] %s749_s14 }
  0x42   :  { %317 = vmatprep.subr.bf16.mxu0 %v920_v17  ;;  %358 = vmatprep.subr.bf16.mxu1 %v922_v18  ;;  %v957_v48 = vld [vmem:[#allocation7 + $0xd8] sm:$0xff]   ;;  %v960_v51 = vld [vmem:[#allocation7 + $0x60] sm:$0xff]   ;;  %v965_v56 = vld [vmem:[#allocation7 + $0xe8] sm:$0xff]   ;;  %s1024_s15 = scalar_lea.vmem %s750_s14, 128  ;;  %p1029_p12 = scmp.lt.s32.totalorder %s750_s14, %s750_s14 }
  0x43   :  { %v958_v49 = vld [vmem:[#allocation7 + $0x18] sm:$0xff]   ;;  %v961_v52 = vld [vmem:[#allocation7 + $0xe0] sm:$0xff]   ;;  %v966_v57 = vld [vmem:[#allocation7 + $0x28] sm:$0xff]   ;;  %p1025_p11 = scmp.ne.s32.totalorder %s750_s14, %s1024_s15  ;;  %p1030_p13 = scmp.lt.s32.totalorder %s1024_s15, %s1024_s15 }
  0x44   :  { %v959_v50 = vld [vmem:[#allocation7 + $0x98] sm:$0xff]   ;;  %v962_v53 = vld [vmem:[#allocation7 + $0x20] sm:$0xff]   ;;  %v967_v58 = vld [vmem:[#allocation7 + $0xa8] sm:$0xff]  }
  0x45   :  { %318 = vmatpush1.bf16.msra.mxu0 %v924_v19  ;;  %359 = vmatpush1.bf16.msra.mxu1 %v925_v20  ;;  %v963_v54 = vld [vmem:[#allocation7 + $0xa0] sm:$0xff]   ;;  %v968_v59 = vld [vmem:[#allocation7 + $0x70] sm:$0xff]   ;;  %v972_v63 = vld [vmem:[#allocation7 + $0x78] sm:$0xff]   ;;  %p1031_p0 = por %p1030_p13, %p1029_p12 }
  0x46   :  { %319 = vmatprep.subr.bf16.mxu0 %v926_v21  ;;  %360 = vmatprep.subr.bf16.mxu1 %v928_v22  ;;  %v969_v60 = vld [vmem:[#allocation7 + $0xf0] sm:$0xff]   ;;  %v973_v0 = vld [vmem:[#allocation7 + $0xf8] sm:$0xff]   ;;  %v127_v7 = vld [vmem:[%s84_s10] sm:$0xf] }
  0x47   :  { %v970_v61 = vld [vmem:[#allocation7 + $0x30] sm:$0xff]   ;;  %v974_v1 = vld [vmem:[#allocation7 + $0x38] sm:$0xff]   ;;  %v132_v10 = vrot.slane %v127_v7, %v131_v5  ;;  %v140_v11 = vrot.slane %v127_v7, %v139_v6  ;;  %v136_v12 = vrot.slane %v127_v7, %v135_v8  ;;  %v144_v13 = vrot.slane %v127_v7, %v143_v9  ;;  %p1032_p1 = pnand %p1031_p0, %p1025_p11 }
  0x48   :  { %v971_v62 = vld [vmem:[#allocation7 + $0xb0] sm:$0xff]   ;;  %v975_v2 = vld [vmem:[#allocation7 + $0xb8] sm:$0xff]  }
  0x49   :  { %320 = vmatpush1.bf16.msra.mxu0 %v930_v23  ;;  %361 = vmatpush1.bf16.msra.mxu1 %v931_v24 }
  0x4a   :  { %321 = vmatprep.subr.bf16.mxu0 %v932_v25  ;;  %362 = vmatprep.subr.bf16.mxu1 %v934_v26 }
  0x4d   :  { %322 = vmatpush1.bf16.msra.mxu0 %v936_v27  ;;  %363 = vmatpush1.bf16.msra.mxu1 %v937_v28 }
  0x4e   :  { %323 = vmatprep.subr.bf16.mxu0 %v938_v29  ;;  %364 = vmatprep.subr.bf16.mxu1 %v940_v30 }
  0x51   :  { %324 = vmatpush1.bf16.msra.mxu0 %v942_v31  ;;  %365 = vmatpush1.bf16.msra.mxu1 %v943_v32 }
  0x52   :  { %844 = vmatprep.subr.bf16.mxu0 %v944_v34  ;;  %866 = vmatprep.subr.bf16.mxu1 %v945_v35 }
  0x54   :  { %342 = vmatmul.mubr.bf16.vlgmr.msra.gmra.mrb[0].mxu0 %v94_v37  ;;  %383 = vmatmul.mubr.bf16.vlgmr.msra.gmra.mrb[0].mxu1 %v94_v37 }
  0x55   :  { %845 = vmatpush3.bf16.msra.mxu0 %v946_v36  ;;  %867 = vmatpush3.bf16.msra.mxu1 %v947_v38  ;;  %v809_v36 = vld [vmem:[%s90_s12] ss:$0 sm:$0xff] }
  0x56   :  { %846 = vmatprep.subr.bf16.mxu0 %v948_v39  ;;  %868 = vmatprep.subr.bf16.mxu1 %v949_v40 }
  0x59   :  { %847 = vmatpush3.bf16.msra.mxu0 %v950_v41  ;;  %869 = vmatpush3.bf16.msra.mxu1 %v951_v42 }
  0x5a   :  { %848 = vmatprep.subr.bf16.mxu0 %v952_v43  ;;  %870 = vmatprep.subr.bf16.mxu1 %v953_v44 }
  0x5d   :  { %849 = vmatpush3.bf16.msra.mxu0 %v954_v45  ;;  %871 = vmatpush3.bf16.msra.mxu1 %v955_v46 }
  0x5e   :  { %850 = vmatprep.subr.bf16.mxu0 %v956_v47  ;;  %872 = vmatprep.subr.bf16.mxu1 %v957_v48 }
  0x61   :  { %851 = vmatpush3.bf16.msra.mxu0 %v958_v49  ;;  %873 = vmatpush3.bf16.msra.mxu1 %v959_v50 }
  0x62   :  { %852 = vmatprep.subr.bf16.mxu0 %v960_v51  ;;  %874 = vmatprep.subr.bf16.mxu1 %v961_v52 }
  0x65   :  { %853 = vmatpush3.bf16.msra.mxu0 %v962_v53  ;;  %875 = vmatpush3.bf16.msra.mxu1 %v963_v54 }
  0x66   :  { %854 = vmatprep.subr.bf16.mxu0 %v964_v55  ;;  %876 = vmatprep.subr.bf16.mxu1 %v965_v56 }
  0x69   :  { %855 = vmatpush3.bf16.msra.mxu0 %v966_v57  ;;  %877 = vmatpush3.bf16.msra.mxu1 %v967_v58 }
  0x6a   :  { %856 = vmatprep.subr.bf16.mxu0 %v968_v59  ;;  %878 = vmatprep.subr.bf16.mxu1 %v969_v60 }
  0x6d   :  { %857 = vmatpush3.bf16.msra.mxu0 %v970_v61  ;;  %879 = vmatpush3.bf16.msra.mxu1 %v971_v62 }
  0x6e   :  { %858 = vmatprep.subr.bf16.mxu0 %v972_v63  ;;  %880 = vmatprep.subr.bf16.mxu1 %v973_v0 }
  0x71   :  { %859 = vmatpush3.bf16.msra.mxu0 %v974_v1  ;;  %881 = vmatpush3.bf16.msra.mxu1 %v975_v2 }
 0x127   :  { %v343_v14 = vpop.f32.mrb[0].mxu0  ;;  %v384_v15 = vpop.f32.mrb[0].mxu1 }
 0x128   :  { %v344_v16 = vadd.f32 %v343_v14, %v132_v10  ;;  %v385_v17 = vadd.f32 %v384_v15, %v140_v11  ;;  %v345_v18 = vpop.f32.mrb[1].mxu0  ;;  %v386_v19 = vpop.f32.mrb[1].mxu1 }
 0x129   :  { %v346_v20 = vadd.f32 %v345_v18, %v136_v12  ;;  %v387_v21 = vadd.f32 %v386_v19, %v144_v13  ;;  %v347_v22 = vpop.f32.mrb[2].mxu0  ;;  %v388_v23 = vpop.f32.mrb[2].mxu1 }
 0x12a   :  { %v391_v24 = vmax.f32 %v344_v16, 0.0  ;;  %v393_v25 = vmax.f32 %v385_v17, 0.0  ;;  %v348_v26 = vpop.f32.mrb[3].mxu0  ;;  %v389_v27 = vpop.f32.mrb[3].mxu1 }
 0x12b   :  { %v392_v28 = vmax.f32 %v346_v20, 0.0  ;;  %v394_v29 = vmax.f32 %v387_v21, 0.0 }
 0x12c   :  { %v397_v30 = vpack.c.bf16 %v393_v25, %v393_v25  ;;  %v395_v33 = vpack.c.bf16 %v391_v24, %v391_v24 }
 0x12d   :  { %v396_v31 = vpack.c.bf16 %v392_v28, %v392_v28  ;;  %v398_v32 = vpack.c.bf16 %v394_v29, %v394_v29 }
 0x12f   :  { %694 = vmatprep.mubr.bf16.mxu0 %v396_v31  ;;  %734 = vmatprep.mubr.bf16.mxu1 %v398_v32 }
 0x130   :  { %695 = vmatmul.mubr.bf16.vlgmr.msra.gmra.mrb[4].mxu0 %v395_v33  ;;  %735 = vmatmul.mubr.bf16.vlgmr.msra.gmra.mrb[4].mxu1 %v397_v30 }
 0x203   :  { %v860_v34 = vpop.f32.mrb[4].mxu0  ;;  %v882_v35 = vpop.f32.mrb[4].mxu1 }
 0x204   :  { %v861_v37 = vpop.f32.mrb[5].mxu0  ;;  %v883_v38 = vpop.f32.mrb[5].mxu1 }
 0x205   :  { %v862_v39 = vadd.f32 %v861_v37, %v860_v34  ;;  %v884_v40 = vadd.f32 %v883_v38, %v882_v35  ;;  %v863_v41 = vpop.f32.mrb[6].mxu0  ;;  %v885_v42 = vpop.f32.mrb[6].mxu1 }
 0x206   :  { %v864_v43 = vpop.f32.mrb[7].mxu0  ;;  %v886_v44 = vpop.f32.mrb[7].mxu1 }
 0x207   :  { %v697_v45 = vadd.f32 %v862_v39, %v809_v36 }
 0x209   :  { %v737_v46 = vadd.f32 %v884_v40, %v697_v45 }
 0x20b   :  { %742 = vst [vmem:[#allocation9] sm:$0xff] %v737_v46 }
 0x20c   :  { %1035 = shalt.err (!%p1032_p1)
}
 0x20d   :  { %s1036_s16 = scalar_lea.hbm %s1160_s6, 128 }
 0x20e   :  { %p1037_p2 = scmp.ne.s32.totalorder %s1160_s6, %s1036_s16  ;;  %p1040_p3 = scmp.lt.u32.totalorder %s1036_s16, %s1160_s6 }
 0x210   :  { %p1042_p4 = pnand %p1040_p3, %p1037_p2 }
 0x212   :  { %1045 = shalt.err (!%p1042_p4)
}
 0x213   :  { %752 = dma.vmem_to_hbm [thread:$0]  %s750_s14, 128, %s1160_s6, [#allocation6]  }
 0x214   :  { %1050 = dma.done.wait [#allocation6], 128  }
 0x215   :  { %1051 = vsyncadd [#allocation6], 4294967168 }
 0x216   :  { %756 = vsyncpa [#allocation5], 1 }
 0x217   :  { %757 = vsyncpa [#allocation8], 1 }
 0x218   :  { %758 = vsyncpa [#allocation6], 1 }

</bundles_post_ra>
